<compile_context>
chip_gen: v7x
topology: tpu7x:2x2x1
jax: 0.10.0
libtpu: 0.0.40
codegen_flags: <defaults>
</compile_context>

<pallas_src>
import jax
import jax.numpy as jnp
from jax.experimental import pallas as pl
from jax.experimental.pallas import tpu as pltpu

NUM_CLASSES = 10


def _par_kernel(x_ref, w_ref, b_ref, o_ref):
    # x_ref: (1, Cin, T)   channel-major pixel tile
    # w_ref: (Cout, Cin)   1x1-conv weight as a matrix
    # b_ref: (Cout, 1)     bias column
    # o_ref: (1, Cout, T)  lane-dense output tile (T multiple of 128 or == H*W)
    acc = jnp.dot(w_ref[...], x_ref[0], preferred_element_type=jnp.float32)
    o_ref[0] = (acc + b_ref[...]).astype(o_ref.dtype)


def _pick_hw_tile(hw, candidates=(2048, 1024, 512, 256, 128)):
    """Largest lane-aligned tile that evenly divides H*W (no padding needed)."""
    for t in candidates:
        if t <= hw and hw % t == 0:
            return t
    # Fallback: one block spanning the full spatial extent (always a legal
    # block shape since it equals the array dim).
    return hw


def par_forward(x_nchw, weight, bias):
    """PAR.forward: grad_reverse (identity fwd) + 1x1 conv.

    x_nchw : (B, Cin, H, W) float32
    weight : (NUM_CLASSES, Cin, 1, 1)  -- PyTorch Conv2d weight layout
    bias   : (NUM_CLASSES,)
    returns: (B, NUM_CLASSES, H, W)
    """
    B, Cin, H, W = x_nchw.shape
    Cout = weight.shape[0]
    HW = H * W

    # grad_reverse is identity in the forward pass.
    # TODO(synk): the scaled gradient reversal is backward-only behavior; wrap
    # this in jax.custom_vjp if the kernel is ever used for training.

    x_mat = x_nchw.reshape(B, Cin, HW)   # contiguous reshape: no HBM transpose
    w_mat = weight.reshape(Cout, Cin)    # (Cout, Cin)
    b_col = bias.reshape(Cout, 1)        # (Cout, 1)

    tile_hw = _pick_hw_tile(HW)
    grid = (B, HW // tile_hw)

    cost = pl.CostEstimate(
        flops=2 * B * HW * Cin * Cout,
        transcendentals=0,
        bytes_accessed=(B * HW * (Cin + Cout) + Cout * (Cin + 1)) * 4,
    )

    out = pl.pallas_call(
        _par_kernel,
        out_shape=jax.ShapeDtypeStruct((B, Cout, HW), x_nchw.dtype),
        grid=grid,
        in_specs=[
            pl.BlockSpec((1, Cin, tile_hw), lambda b, j: (b, 0, j)),
            pl.BlockSpec((Cout, Cin), lambda b, j: (0, 0)),
            pl.BlockSpec((Cout, 1), lambda b, j: (0, 0)),
        ],
        out_specs=pl.BlockSpec((1, Cout, tile_hw), lambda b, j: (b, 0, j)),
        compiler_params=pltpu.CompilerParams(
            dimension_semantics=("parallel", "parallel")),
        cost_estimate=cost,
    )(x_mat, w_mat, b_col)

    return out.reshape(B, Cout, H, W)    # contiguous reshape: no HBM transpose


if __name__ == "__main__":
    key = jax.random.PRNGKey(0)
    k_x, k_w, k_b = jax.random.split(key, 3)

    # Small shapes consistent with the module: inchannel=4, scale=1.0
    B, Cin, H, W = 2, 4, 16, 16
    scale = 1.0  # only affects backward of grad_reverse; forward is identity

    x = jax.random.normal(k_x, (B, Cin, H, W), dtype=jnp.float32)
    # Deterministic synthetic Conv2d(Cin, NUM_CLASSES, 1) parameters.
    weight = jax.random.normal(k_w, (NUM_CLASSES, Cin, 1, 1), dtype=jnp.float32) * 0.1
    bias = jax.random.normal(k_b, (NUM_CLASSES,), dtype=jnp.float32) * 0.1

    out = par_forward(x, weight, bias)
    jax.block_until_ready(out)

    # Sanity check vs. plain-JAX reference (1x1 conv == channel matmul).
    ref = jnp.einsum("bchw,oc->bohw", x, weight.reshape(NUM_CLASSES, Cin)) \
          + bias.reshape(1, NUM_CLASSES, 1, 1)
    assert out.shape == (B, NUM_CLASSES, H, W)
    assert jnp.allclose(out, ref, atol=1e-5, rtol=1e-5)

    print("KERNEL_OK")
</pallas_src>

<mosaic_0001>
module attributes {stable_mosaic.version = 11 : i64} {
  func.func @_par_kernel(%arg0: i32, %arg1: i32, %arg2: memref<1x4x256xf32, #tpu.memory_space<vmem>>, %arg3: memref<10x4xf32, #tpu.memory_space<vmem>>, %arg4: memref<10x1xf32, #tpu.memory_space<vmem>>, %arg5: memref<1x10x256xf32, #tpu.memory_space<vmem>>) attributes {dimension_semantics = [#tpu.dimension_semantics<parallel>, #tpu.dimension_semantics<parallel>], iteration_bounds = array<i64: 2, 1>, scalar_prefetch = 0 : i64, scratch_operands = 0 : i64, tpu.core_type = #tpu.core_type<tc>, window_params = [{transform_indices = @transform_0, window_bounds = array<i64: 1, 4, 256>}, {pipeline_mode = #tpu.pipeline_mode<synchronous>, transform_indices = @transform_1, window_bounds = array<i64: 10, 4>}, {pipeline_mode = #tpu.pipeline_mode<synchronous>, transform_indices = @transform_2, window_bounds = array<i64: 10, 1>}, {transform_indices = @transform_3, window_bounds = array<i64: 1, 10, 256>}]} {
    %c0 = arith.constant 0 : index
    %c0_0 = arith.constant 0 : index
    %0 = vector.load %arg3[%c0, %c0_0] : memref<10x4xf32, #tpu.memory_space<vmem>>, vector<10x4xf32>
    %c0_1 = arith.constant 0 : index
    %c0_2 = arith.constant 0 : index
    %c0_3 = arith.constant 0 : index
    %1 = vector.load %arg2[%c0_1, %c0_2, %c0_3] : memref<1x4x256xf32, #tpu.memory_space<vmem>>, vector<1x4x256xf32>
    %2 = vector.shape_cast %1 : vector<1x4x256xf32> to vector<4x256xf32>
    %cst = arith.constant dense<0.000000e+00> : vector<10x256xf32>
    %3 = tpu.matmul %0, %2, %cst {dimension_numbers = #tpu.dot_dimension_numbers<[1], [0], [0], [1], [0, 0, 1, 1], [], []>} : vector<10x4xf32>, vector<4x256xf32>, vector<10x256xf32> -> vector<10x256xf32>
    %c0_4 = arith.constant 0 : index
    %c0_5 = arith.constant 0 : index
    %4 = vector.load %arg4[%c0_4, %c0_5] : memref<10x1xf32, #tpu.memory_space<vmem>>, vector<10x1xf32>
    %5 = vector.broadcast %4 : vector<10x1xf32> to vector<10x256xf32>
    %6 = arith.addf %3, %5 : vector<10x256xf32>
    %c0_6 = arith.constant 0 : index
    %c0_7 = arith.constant 0 : index
    %c0_8 = arith.constant 0 : index
    %7 = vector.load %arg5[%c0_6, %c0_7, %c0_8] : memref<1x10x256xf32, #tpu.memory_space<vmem>>, vector<1x10x256xf32>
    %8 = vector.shape_cast %7 : vector<1x10x256xf32> to vector<10x256xf32>
    %9 = vector.shape_cast %6 : vector<10x256xf32> to vector<1x10x256xf32>
    tpu.vector_store %arg5[%c0_6, %c0_7, %c0_8], %9 {strides = array<i32>} : memref<1x10x256xf32, #tpu.memory_space<vmem>>, vector<1x10x256xf32>,
    return
  }
  func.func @transform_0(%arg0: i32, %arg1: i32) -> (i32, i32, i32) {
    %c0_i32 = arith.constant 0 : i32
    %c0_i32_0 = arith.constant 0 : i32
    return %arg0, %c0_i32, %arg1 : i32, i32, i32
  }
  func.func @transform_1(%arg0: i32, %arg1: i32) -> (i32, i32) {
    %c0_i32 = arith.constant 0 : i32
    %c0_i32_0 = arith.constant 0 : i32
    %c0_i32_1 = arith.constant 0 : i32
    return %c0_i32, %c0_i32_0 : i32, i32
  }
  func.func @transform_2(%arg0: i32, %arg1: i32) -> (i32, i32) {
    %c0_i32 = arith.constant 0 : i32
    %c0_i32_0 = arith.constant 0 : i32
    %c0_i32_1 = arith.constant 0 : i32
    return %c0_i32, %c0_i32_0 : i32, i32
  }
  func.func @transform_3(%arg0: i32, %arg1: i32) -> (i32, i32, i32) {
    %c0_i32 = arith.constant 0 : i32
    %c0_i32_0 = arith.constant 0 : i32
    return %arg0, %c0_i32, %arg1 : i32, i32, i32
  }
}

</mosaic_0001>

<bundles_post_ra>
// kernel: tpu_custom_call.1
= control target key start
LH: loop header
LB: loop body
LE: loop exit
PB: predicated region body
PF: predicated region fallthrough
CT: control target
= control target key end

     0   :  { %s500_s12 = smov 0   ;;  %s502_s13 = smov 0   ;;  %s545_s0 = inlined_call_operand.vmem [shape: f32[2,4,256], index: 0, kind: input, shape index: {}]   ;;  %s546_s1 = inlined_call_operand.vmem [shape: f32[10,4], index: 1, kind: input, shape index: {}]   ;;  %s547_s2 = inlined_call_operand.vmem [shape: f32[10,1], index: 2, kind: input, shape index: {}]   ;;  %s548_s3 = inlined_call_operand.vmem [shape: f32[2,10,256], index: 3, kind: output, shape index: {}]  }
   0x1   :  { %s504_s14 = smov 0  }
   0x2 LB: > { %s25_s15 = sadd.s32 1, %s472_s13  ;;  %p411_p0 = scmp.ge.s32.totalorder %s476_s14, 1  ;;  %s476_s14 = sphi %s504_s14, %s13_s14   ;;  %s472_s13 = sphi %s502_s13, %s550_s13   ;;  %s468_s12 = sphi %s500_s12, %s549_s12  }
   0x3   : > { %p27_p1 = scmp.ge.s32.totalorder %s25_s15, 2  ;;  %p158_p2 = scmp.lt.s32.totalorder %s476_s14, 3 }
   0x5   : > { %s552_s15 = smov (%p27_p1, %s25_s15), 0  ;;  %p159_p3 = pnand %p411_p0, %p158_p2 }
   0x6   : > { %p191_p4 = scmp.lt.s32.totalorder (!%p159_p3), %s468_s12, 1  ;;  %v478_v0 = vmov (!%p159_p3), 0.0   ;;  %v213_v1 = vld [vmem:[%s547_s2] sm:$0xff] (!%p159_p3)  ;;  %v479_v2 = vmov (!%p159_p3), 0   ;;  %v214_v3 = vld [vmem:[%s547_s2 + $0x8] sm:$0x3] (!%p159_p3) }
   0x7   : > { %162 = sbr.rel (%p159_p3) target bundleno = 238 (0xee), region = 32  ;;  %303 = vmatprep.mubr.f32.mxu0 (!%p159_p3), %v478_v0  ;;  %309 = vmatprep.mubr.f32.mxu1 (!%p159_p3), %v478_v0  ;;  %vm234_vm0 = vcmask (!%p159_p3), 1043456   ;;  %v210_v6 = vld [vmem:[%s546_s1] sm:$0xff] (!%p159_p3)  ;;  %vm227_vm1 = vcmask (!%p159_p3), 31744   ;;  %v211_v7 = vld [vmem:[%s546_s1 + $0x8] sm:$0x3] (!%p159_p3) }
   0x8   : > { %452 = vset.pattern.permute.xlu0 (!%p159_p3), %v479_v2 }
   0x9   : > { %217 = vperm.xlu0 (!%p159_p3), %452, %v213_v1  }
   0xd   : > { %222 = vperm.xlu0 (!%p159_p3), %452, %v214_v3  }
   0xe   : > { %s554_s12 = smov (!%p191_p4, %s468_s12), 1 }
   0xf   : > { %s422_s18 = sshll.u32 %s554_s12, 3  ;;  %s423_s28 = sshll.u32 %s554_s12, 5 }
  0x10   : > { %s198_s23 = scalar_lea.vmem %s545_s0, %s422_s18  ;;  %s208_s4 = scalar_lea.vmem %s548_s3, %s423_s28 }
  0x11   : > { %v212_v4 = vld [vmem:[%s198_s23] sm:$0xff] }
  0x12   : > { %v226_v5 = vcombine.high %v212_v4, %v212_v4 }
  0x14   : > { %416 = vmatprep.subr.msk.mxu0 %vm234_vm0, %v226_v5  ;;  %424 = vmatprep.subr.msk.mxu1 %vm234_vm0, %v226_v5 }
  0x15   : > { %417 = vmatpush1.msk.msra.mxu0 %vm234_vm0, %v212_v4  ;;  %425 = vmatpush1.msk.msra.mxu1 %vm234_vm0, %v212_v4 }
  0x16   : > { %418 = vmatmul.mubr.msk.f32.vlgmr.msra.gmra.mrb[0].mxu0 %vm227_vm1, %v210_v6  ;;  %419 = vmatmul.mubr.msk.f32.vlgmr.msra.gmra.mrb[0].mxu1 %vm227_vm1, %v211_v7 }
  0x88   : > { %v218_v8 = vpop.permute.xlu0 %217 }
  0x8c   : > { %v223_v9 = vpop.permute.xlu0 %222 }
  0xe9   : > { %v305_v10 = vpop.f32.mrb[0].mxu0  ;;  %v311_v11 = vpop.f32.mrb[0].mxu1 }
  0xea   : > { %v306_v12 = vadd.f32 %v305_v10, %v218_v8  ;;  %v312_v13 = vadd.f32 %v311_v11, %v223_v9  ;;  %v307_v14 = vpop.f32.mrb[1].mxu0  ;;  %v313_v15 = vpop.f32.mrb[1].mxu1 }
  0xeb   : > { %v308_v16 = vadd.f32 %v307_v14, %v218_v8  ;;  %v314_v17 = vadd.f32 %v313_v15, %v223_v9 }
  0xec   : > { %316 = vst [vmem:[%s208_s4] sm:$0xff] %v306_v12  ;;  %318 = vst [vmem:[%s208_s4 + $0x10] sm:$0x3] %v312_v13 }
  0xed   : > { %317 = vst [vmem:[%s208_s4 + $0x8] sm:$0xff] %v308_v16  ;;  %319 = vst [vmem:[%s208_s4 + $0x18] sm:$0x3] %v314_v17 }
  0xee PF: > { %s13_s14 = sadd.s32 1, %s476_s14   ;;  %s549_s12 = smov %s472_s13 }
  0xef   : > { %p10_p5 = scmp.ge.s32.totalorder %s13_s14, 4   ;;  %s550_s13 = smov %s552_s15 }
  0xf1   :  { %12 = sbr.rel (!%p10_p5) target bundleno = 2 (0x2), region = 62 }

</bundles_post_ra>
